<compile_context>
chip_gen: v7x
topology: tpu7x:2x2x1
jax: 0.10.0
libtpu: 0.0.40
codegen_flags: <defaults>
</compile_context>

<pallas_src>
import math
from functools import partial

import jax
import jax.numpy as jnp
from jax.experimental import pallas as pl
from jax.experimental.pallas import tpu as pltpu

NUM_MC_SAMPLES = 5
DROP_P = 0.1
KEEP_P = 1.0 - DROP_P

_LANE = 128           # lane-dense last dim of every block
_MAX_TILE_ROWS = 1024  # (1024, 128) f32 tile = 512 KiB per buffer


def _binomial_cdf_thresholds_24():
    """CDF cut points of K ~ Binomial(n, keep_p), quantized to 24-bit uniforms.

    K (number of kept samples per element) is drawn by comparing one 24-bit
    uniform against these 5 thresholds:  K = sum_k [u >= F(k)],  k = 0..4.
    """
    ths = []
    cdf = 0.0
    for k in range(NUM_MC_SAMPLES):  # F(0) .. F(n-1)
        pmf = (math.comb(NUM_MC_SAMPLES, k)
               * (KEEP_P ** k) * (DROP_P ** (NUM_MC_SAMPLES - k)))
        cdf += pmf
        ths.append(int(round(cdf * float(1 << 24))))
    return tuple(ths)


_K_THRESHOLDS_24 = _binomial_cdf_thresholds_24()

# int32 bit patterns of the usual uint32 hashing constants.
_GOLDEN = -1640531527   # 0x9E3779B9
_MIX_M1 = 2146120493    # 0x7FEB352D
_MIX_M2 = -2073319797   # 0x846CA68B


def _mix32(x):
    """splitmix32-style avalanche on int32 (logical shifts emulated by masks)."""
    x = x ^ ((x >> 16) & 0xFFFF)
    x = x * _MIX_M1
    x = x ^ ((x >> 15) & 0x1FFFF)
    x = x * _MIX_M2
    x = x ^ ((x >> 16) & 0xFFFF)
    return x


def _mc_dropout_kernel(seed_ref, x_ref, mean_ref, varsum_ref, acc_ref):
    """MC-dropout mean + running variance sum over lane-dense tiles.

    seed_ref   : SMEM scalar-prefetch ref, int32[1]
    x_ref      : VMEM ref, [tile_rows, 128] (input dtype)
    mean_ref   : VMEM ref, [tile_rows, 128] (input dtype)  -- MC mean
    varsum_ref : VMEM ref, f32[1, 1]  -- sum of per-element sample variance
    acc_ref    : SMEM scratch, f32[1] -- running variance sum across tiles
    """
    i = pl.program_id(0)
    n_tiles = pl.num_programs(0)
    tile_rows, lane = x_ref.shape

    @pl.when(i == 0)
    def _init():
        acc_ref[0] = jnp.float32(0.0)

    x = x_ref[...].astype(jnp.float32)

    # Global element index -> counter-based PRNG state (tiling/grid invariant).
    row = jax.lax.broadcasted_iota(jnp.int32, (tile_rows, lane), 0)
    col = jax.lax.broadcasted_iota(jnp.int32, (tile_rows, lane), 1)
    gidx = (i * tile_rows + row) * lane + col
    state = gidx * _GOLDEN + seed_ref[0]

    # One 24-bit uniform per element; K = #kept samples via inverse-CDF.
    bits = _mix32(state)
    r24 = (bits >> 8) & 0xFFFFFF
    k = jnp.zeros_like(x)
    for t in _K_THRESHOLDS_24:           # 5 integer compares, statically unrolled
        k = k + (r24 >= t).astype(jnp.float32)

    n = float(NUM_MC_SAMPLES)
    inv_keep = 1.0 / KEEP_P
    # sample_s = x * inv_keep * keep_s  (keep_s in {0,1});  only K matters:
    #   mean  = x * inv_keep * K / n
    #   sumsq = x^2 * inv_keep^2 * K
    #   var   = (sumsq - n*mean^2)/(n-1) = x^2 * inv_keep^2 * (K - K^2/n)/(n-1)
    mean = x * (k * (inv_keep / n))
    var = (x * x) * ((k - k * k * (1.0 / n)) * (inv_keep * inv_keep / (n - 1.0)))

    mean_ref[...] = mean.astype(mean_ref.dtype)
    acc_ref[0] = acc_ref[0] + jnp.sum(var)

    @pl.when(i == n_tiles - 1)
    def _finalize():
        varsum_ref[...] = jnp.reshape(acc_ref[0], (1, 1))


@jax.jit
def _estimate_uncertainty_impl(hidden_states, seed_arr):
    orig_shape = hidden_states.shape
    orig_dtype = hidden_states.dtype

    total = 1
    for d in orig_shape:
        total *= int(d)

    rows = -(-total // _LANE)
    if rows <= _MAX_TILE_ROWS:
        tile_rows = rows            # single tile: block == full array dims
        padded_rows = rows
    else:
        tile_rows = _MAX_TILE_ROWS  # multiple of 8 -> valid sublane tiling
        padded_rows = -(-rows // _MAX_TILE_ROWS) * _MAX_TILE_ROWS
    num_tiles = padded_rows // tile_rows
    padded_total = padded_rows * _LANE

    x_flat = jnp.reshape(hidden_states, (-1,))
    if padded_total != total:
        # Zero padding contributes exactly 0 to mean and variance sums.
        x_flat = jnp.pad(x_flat, (0, padded_total - total))
    x2d = jnp.reshape(x_flat, (padded_rows, _LANE))

    grid_spec = pltpu.PrefetchScalarGridSpec(
        num_scalar_prefetch=1,
        grid=(num_tiles,),
        in_specs=[
            pl.BlockSpec((tile_rows, _LANE), lambda i, seed_ref: (i, 0)),
        ],
        out_specs=[
            pl.BlockSpec((tile_rows, _LANE), lambda i, seed_ref: (i, 0)),
            pl.BlockSpec((1, 1), lambda i, seed_ref: (0, 0)),
        ],
        scratch_shapes=[pltpu.SMEM((1,), jnp.float32)],
    )

    mean2d, var_sum = pl.pallas_call(
        _mc_dropout_kernel,
        grid_spec=grid_spec,
        out_shape=(
            jax.ShapeDtypeStruct((padded_rows, _LANE), orig_dtype),
            jax.ShapeDtypeStruct((1, 1), jnp.float32),
        ),
        compiler_params=pltpu.CompilerParams(
            # Scalar accumulator is carried across the tile axis -> sequential.
            # TODO(synk): on v7x, emit per-core partial sums to regain 2-TC parallelism.
            dimension_semantics=("arbitrary",),
        ),
    )(seed_arr, x2d)

    uncertainty = var_sum[0, 0] / jnp.float32(total)

    # Global scaling couples all elements -> cheap fused XLA epilogue.
    mean_flat = mean2d.reshape(-1)[:total].astype(jnp.float32)
    adjusted = (mean_flat * (1.0 - uncertainty)).astype(orig_dtype)
    adjusted = adjusted.reshape(orig_shape)
    return adjusted, uncertainty


def estimate_uncertainty(hidden_states: jax.Array, seed: int = 0):
    """Pallas equivalent of BaseReasoner.estimate_uncertainty.

    Returns:
      (adjusted_hidden_states with the input's shape/dtype,
       uncertainty as a 0-d f32 device array — no host sync on the hot path)
    """
    seed_arr = jnp.asarray([seed], dtype=jnp.int32)
    return _estimate_uncertainty_impl(hidden_states, seed_arr)


class BaseReasonerPallas:
    """JAX/Pallas port of BaseReasoner. `forward` is abstract in the reference;
    the concrete hot path is estimate_uncertainty."""

    def __init__(self, config=None):
        self.config = config  # ReasoningConfig holds only scalars/enums; no params.

    def forward(self, hidden_states, attention_mask=None, return_dict=False, **kwargs):
        # TODO(synk): base class forward raises NotImplementedError in PyTorch;
        # subclasses define the actual reasoning computation.
        raise NotImplementedError("Subclasses must implement forward method")

    def estimate_uncertainty(self, hidden_states, seed: int = 0):
        return estimate_uncertainty(hidden_states, seed=seed)


if __name__ == "__main__":
    # Small shapes implied by the module docstring: [batch, seq, hidden]
    B, S, H = 2, 8, 32
    key = jax.random.PRNGKey(0)
    hidden_states = jax.random.normal(key, (B, S, H), dtype=jnp.float32)

    reasoner = BaseReasonerPallas()
    adjusted, uncertainty = reasoner.estimate_uncertainty(hidden_states, seed=0)
    adjusted = jax.block_until_ready(adjusted)
    unc = float(uncertainty)  # host transfer only in the demo, not in the wrapper

    # Sanity: shape/dtype preserved, uncertainty is a small non-negative scalar
    # (expected ~0.11 for unit-normal inputs: x^2 * p(1-p)/keep_p^2), outputs finite.
    assert adjusted.shape == (B, S, H)
    assert adjusted.dtype == jnp.float32
    assert 0.0 <= unc < 1.0
    assert jnp.isfinite(adjusted).all()

    print("KERNEL_OK")
</pallas_src>

<mosaic_0001>
module attributes {stable_mosaic.version = 11 : i64} {
  func.func @_mc_dropout_kernel(%arg0: i32, %arg1: memref<1xi32, #tpu.memory_space<smem>>, %arg2: memref<4x128xf32, #tpu.memory_space<vmem>>, %arg3: memref<4x128xf32, #tpu.memory_space<vmem>>, %arg4: memref<1x1xf32, #tpu.memory_space<vmem>>, %arg5: memref<1xf32, #tpu.memory_space<smem>>) attributes {dimension_semantics = [#tpu.dimension_semantics<arbitrary>], iteration_bounds = array<i64: 1>, scalar_prefetch = 1 : i64, scratch_operands = 1 : i64, tpu.core_type = #tpu.core_type<tc>, window_params = [{transform_indices = @transform_0, window_bounds = array<i64: 4, 128>}, {transform_indices = @transform_1, window_bounds = array<i64: 4, 128>}, {pipeline_mode = #tpu.pipeline_mode<synchronous>, transform_indices = @transform_2, window_bounds = array<i64: 1, 1>}]} {
    %c0_i32 = arith.constant 0 : i32
    %0 = arith.cmpi eq, %arg0, %c0_i32 : i32
    %1 = arith.extui %0 : i1 to i32
    %c0_i32_0 = arith.constant 0 : i32
    %2 = arith.cmpi ne, %1, %c0_i32_0 : i32
    scf.if %2 {
      %cst_15 = arith.constant 0.000000e+00 : f32
      %c0_16 = arith.constant 0 : index
      %88 = memref.load %arg5[%c0_16] : memref<1xf32, #tpu.memory_space<smem>>
      memref.store %cst_15, %arg5[%c0_16] : memref<1xf32, #tpu.memory_space<smem>>
    } else {
    }
    %c0 = arith.constant 0 : index
    %c0_1 = arith.constant 0 : index
    %3 = vector.load %arg2[%c0, %c0_1] : memref<4x128xf32, #tpu.memory_space<vmem>>, vector<4x128xf32>
    %4 = tpu.iota {dimensions = array<i32: 0>} : vector<4x128xi32>
    %5 = tpu.iota {dimensions = array<i32: 1>} : vector<4x128xi32>
    %c4_i32 = arith.constant 4 : i32
    %6 = arith.muli %arg0, %c4_i32 : i32
    %7 = vector.broadcast %6 : i32 to vector<4x128xi32>
    %8 = arith.addi %7, %4 : vector<4x128xi32>
    %c128_i32 = arith.constant 128 : i32
    %9 = vector.broadcast %c128_i32 : i32 to vector<4x128xi32>
    %10 = arith.muli %8, %9 : vector<4x128xi32>
    %11 = arith.addi %10, %5 : vector<4x128xi32>
    %c-1640531527_i32 = arith.constant -1640531527 : i32
    %12 = vector.broadcast %c-1640531527_i32 : i32 to vector<4x128xi32>
    %13 = arith.muli %11, %12 : vector<4x128xi32>
    %c0_2 = arith.constant 0 : index
    %14 = memref.load %arg1[%c0_2] : memref<1xi32, #tpu.memory_space<smem>>
    %15 = vector.broadcast %14 : i32 to vector<4x128xi32>
    %16 = arith.addi %13, %15 : vector<4x128xi32>
    %c16_i32 = arith.constant 16 : i32
    %17 = vector.broadcast %c16_i32 : i32 to vector<4x128xi32>
    %18 = arith.shrsi %16, %17 : vector<4x128xi32>
    %c65535_i32 = arith.constant 65535 : i32
    %19 = vector.broadcast %c65535_i32 : i32 to vector<4x128xi32>
    %20 = arith.andi %18, %19 : vector<4x128xi32>
    %21 = arith.xori %16, %20 : vector<4x128xi32>
    %c2146120493_i32 = arith.constant 2146120493 : i32
    %22 = vector.broadcast %c2146120493_i32 : i32 to vector<4x128xi32>
    %23 = arith.muli %21, %22 : vector<4x128xi32>
    %c15_i32 = arith.constant 15 : i32
    %24 = vector.broadcast %c15_i32 : i32 to vector<4x128xi32>
    %25 = arith.shrsi %23, %24 : vector<4x128xi32>
    %c131071_i32 = arith.constant 131071 : i32
    %26 = vector.broadcast %c131071_i32 : i32 to vector<4x128xi32>
    %27 = arith.andi %25, %26 : vector<4x128xi32>
    %28 = arith.xori %23, %27 : vector<4x128xi32>
    %c-2073319797_i32 = arith.constant -2073319797 : i32
    %29 = vector.broadcast %c-2073319797_i32 : i32 to vector<4x128xi32>
    %30 = arith.muli %28, %29 : vector<4x128xi32>
    %c16_i32_3 = arith.constant 16 : i32
    %31 = vector.broadcast %c16_i32_3 : i32 to vector<4x128xi32>
    %32 = arith.shrsi %30, %31 : vector<4x128xi32>
    %c65535_i32_4 = arith.constant 65535 : i32
    %33 = vector.broadcast %c65535_i32_4 : i32 to vector<4x128xi32>
    %34 = arith.andi %32, %33 : vector<4x128xi32>
    %35 = arith.xori %30, %34 : vector<4x128xi32>
    %c8_i32 = arith.constant 8 : i32
    %36 = vector.broadcast %c8_i32 : i32 to vector<4x128xi32>
    %37 = arith.shrsi %35, %36 : vector<4x128xi32>
    %c16777215_i32 = arith.constant 16777215 : i32
    %38 = vector.broadcast %c16777215_i32 : i32 to vector<4x128xi32>
    %39 = arith.andi %37, %38 : vector<4x128xi32>
    %cst = arith.constant 0.000000e+00 : f32
    %40 = vector.broadcast %cst : f32 to vector<4x128xf32>
    %c168_i32 = arith.constant 168 : i32
    %41 = vector.broadcast %c168_i32 : i32 to vector<4x128xi32>
    %42 = arith.cmpi sge, %39, %41 : vector<4x128xi32>
    %43 = arith.extui %42 : vector<4x128xi1> to vector<4x128xi32>
    %44 = arith.sitofp %43 : vector<4x128xi32> to vector<4x128xf32>
    %45 = arith.addf %40, %44 : vector<4x128xf32>
    %c7718_i32 = arith.constant 7718 : i32
    %46 = vector.broadcast %c7718_i32 : i32 to vector<4x128xi32>
    %47 = arith.cmpi sge, %39, %46 : vector<4x128xi32>
    %48 = arith.extui %47 : vector<4x128xi1> to vector<4x128xi32>
    %49 = arith.sitofp %48 : vector<4x128xi32> to vector<4x128xf32>
    %50 = arith.addf %45, %49 : vector<4x128xf32>
    %c143613_i32 = arith.constant 143613 : i32
    %51 = vector.broadcast %c143613_i32 : i32 to vector<4x128xi32>
    %52 = arith.cmpi sge, %39, %51 : vector<4x128xi32>
    %53 = arith.extui %52 : vector<4x128xi1> to vector<4x128xi32>
    %54 = arith.sitofp %53 : vector<4x128xi32> to vector<4x128xf32>
    %55 = arith.addf %50, %54 : vector<4x128xf32>
    %c1366672_i32 = arith.constant 1366672 : i32
    %56 = vector.broadcast %c1366672_i32 : i32 to vector<4x128xi32>
    %57 = arith.cmpi sge, %39, %56 : vector<4x128xi32>
    %58 = arith.extui %57 : vector<4x128xi1> to vector<4x128xi32>
    %59 = arith.sitofp %58 : vector<4x128xi32> to vector<4x128xf32>
    %60 = arith.addf %55, %59 : vector<4x128xf32>
    %c6870438_i32 = arith.constant 6870438 : i32
    %61 = vector.broadcast %c6870438_i32 : i32 to vector<4x128xi32>
    %62 = arith.cmpi sge, %39, %61 : vector<4x128xi32>
    %63 = arith.extui %62 : vector<4x128xi1> to vector<4x128xi32>
    %64 = arith.sitofp %63 : vector<4x128xi32> to vector<4x128xf32>
    %65 = arith.addf %60, %64 : vector<4x128xf32>
    %cst_5 = arith.constant 0.222222224 : f32
    %66 = vector.broadcast %cst_5 : f32 to vector<4x128xf32>
    %67 = arith.mulf %65, %66 : vector<4x128xf32>
    %68 = arith.mulf %3, %67 : vector<4x128xf32>
    %69 = arith.mulf %3, %3 : vector<4x128xf32>
    %70 = arith.mulf %65, %65 : vector<4x128xf32>
    %cst_6 = arith.constant 2.000000e-01 : f32
    %71 = vector.broadcast %cst_6 : f32 to vector<4x128xf32>
    %72 = arith.mulf %70, %71 : vector<4x128xf32>
    %73 = arith.subf %65, %72 : vector<4x128xf32>
    %cst_7 = arith.constant 0.30864197 : f32
    %74 = vector.broadcast %cst_7 : f32 to vector<4x128xf32>
    %75 = arith.mulf %73, %74 : vector<4x128xf32>
    %76 = arith.mulf %69, %75 : vector<4x128xf32>
    %c0_8 = arith.constant 0 : index
    %c0_9 = arith.constant 0 : index
    %77 = vector.load %arg3[%c0_8, %c0_9] : memref<4x128xf32, #tpu.memory_space<vmem>>, vector<4x128xf32>
    tpu.vector_store %arg3[%c0_8, %c0_9], %68 {strides = array<i32>} : memref<4x128xf32, #tpu.memory_space<vmem>>, vector<4x128xf32>,
    %c0_10 = arith.constant 0 : index
    %78 = memref.load %arg5[%c0_10] : memref<1xf32, #tpu.memory_space<smem>>
    %79 = vector.shape_cast %76 : vector<4x128xf32> to vector<1x4x128xf32>
    %cst_11 = arith.constant dense<0.000000e+00> : vector<1xf32>
    %80 = vector.multi_reduction <add>, %79, %cst_11 [1, 2] : vector<1x4x128xf32> to vector<1xf32>
    %81 = vector.shape_cast %80 : vector<1xf32> to vector<1x1x1xf32>
    %82 = vector.extract %81[0, 0, 0] : f32 from vector<1x1x1xf32>
    %83 = arith.addf %78, %82 : f32
    %c0_12 = arith.constant 0 : index
    %84 = memref.load %arg5[%c0_12] : memref<1xf32, #tpu.memory_space<smem>>
    memref.store %83, %arg5[%c0_12] : memref<1xf32, #tpu.memory_space<smem>>
    %c0_i32_13 = arith.constant 0 : i32
    %85 = arith.cmpi eq, %arg0, %c0_i32_13 : i32
    %86 = arith.extui %85 : i1 to i32
    %c0_i32_14 = arith.constant 0 : i32
    %87 = arith.cmpi ne, %86, %c0_i32_14 : i32
    scf.if %87 {
      %c0_15 = arith.constant 0 : index
      %88 = memref.load %arg5[%c0_15] : memref<1xf32, #tpu.memory_space<smem>>
      %89 = vector.broadcast %88 : f32 to vector<1x1xf32>
      %c0_16 = arith.constant 0 : index
      %c0_17 = arith.constant 0 : index
      %90 = vector.load %arg4[%c0_16, %c0_17] : memref<1x1xf32, #tpu.memory_space<vmem>>, vector<1x1xf32>
      tpu.vector_store %arg4[%c0_16, %c0_17], %89 {strides = array<i32>} : memref<1x1xf32, #tpu.memory_space<vmem>>, vector<1x1xf32>,
    } else {
    }
    return
  }
  func.func @transform_0(%arg0: i32, %arg1: memref<1xi32, #tpu.memory_space<smem>>) -> (i32, i32) {
    %c0_i32 = arith.constant 0 : i32
    %c0_i32_0 = arith.constant 0 : i32
    return %arg0, %c0_i32 : i32, i32
  }
  func.func @transform_1(%arg0: i32, %arg1: memref<1xi32, #tpu.memory_space<smem>>) -> (i32, i32) {
    %c0_i32 = arith.constant 0 : i32
    %c0_i32_0 = arith.constant 0 : i32
    return %arg0, %c0_i32 : i32, i32
  }
  func.func @transform_2(%arg0: i32, %arg1: memref<1xi32, #tpu.memory_space<smem>>) -> (i32, i32) {
    %c0_i32 = arith.constant 0 : i32
    %c0_i32_0 = arith.constant 0 : i32
    %c0_i32_1 = arith.constant 0 : i32
    return %c0_i32, %c0_i32_0 : i32, i32
  }
}

</mosaic_0001>

<bundles_post_ra>
// kernel: _estimate_uncertainty_impl.1
= control target key start
LH: loop header
LB: loop body
LE: loop exit
PB: predicated region body
PF: predicated region fallthrough
CT: control target
= control target key end

     0   :  { %v20_v0 = vlaneseq  ;;  %s195_s0 = inlined_call_operand.<no memory space> [shape: s32[1], index: 0, kind: input, shape index: {}]   ;;  %s196_s1 = inlined_call_operand.vmem [shape: f32[4,128], index: 1, kind: input, shape index: {}]   ;;  %s197_s2 = inlined_call_operand.vmem [shape: f32[4,128], index: 2, kind: output, shape index: {0}]   ;;  %s198_s3 = inlined_call_operand.hbm [shape: f32[1,1], index: 3, kind: output, shape index: {1}]  }
   0x1   :  { %10 = vsyncpa [#allocation6], 0  ;;  %v31_v5 = vstv %s195_s0  ;;  %v152_v17 = vmov 0.0   ;;  %v19_v29 = vld [vmem:[%s196_s1] sm:$0xf]  ;;  %vm76_vm5 = vcmask 1043456  }
   0x2   :  { %v21_v1 = vshrl.u32 %v20_v0, 7  ;;  %v23_v2 = vand.u32 127, %v20_v0  ;;  %v68_v32 = vmul.f32 %v19_v29, %v19_v29  ;;  %s153_s1 = smov [#allocation5]   ;;  %vm95_vm6 = vcmask 0  }
   0x3   :  { %s105_s17 = sshll.u32 %s153_s1, 4  ;;  %s106_s17 = int_to_ptr.vmem [resolvable:$true] %s105_s17 }
   0x4   :  { %v27_v3 = vmul.u32 128, %v21_v1  ;;  %s132_s19 = scalar_lea.vmem %s106_s17, 32  ;;  %p133_p1 = scmp.lt.s32.totalorder %s106_s17, %s106_s17 }
   0x6   :  { %v28_v4 = vadd.s32 %v27_v3, %v23_v2 }
   0x8   :  { %v29_v6 = vmul.u32 2654435769, %v28_v4 }
   0xa   :  { %v32_v7 = vadd.s32 %v31_v5, %v29_v6 }
   0xc   :  { %v115_v8 = vshrl.u32 %v32_v7, 16 }
   0xe   :  { %v35_v9 = vxor.u32 %v115_v8, %v32_v7 }
  0x10   :  { %v36_v10 = vmul.u32 2146120493, %v35_v9 }
  0x12   :  { %v116_v11 = vshrl.u32 %v36_v10, 15 }
  0x14   :  { %v39_v12 = vxor.u32 %v116_v11, %v36_v10 }
  0x16   :  { %v40_v13 = vmul.u32 2221647499, %v39_v12 }
  0x18   :  { %v117_v14 = vshrl.u32 %v40_v13, 16 }
  0x1a   :  { %v43_v15 = vxor.u32 %v117_v14, %v40_v13 }
  0x1c   :  { %v118_v16 = vshrl.u32 %v43_v15, 8 }
  0x1e   :  { %vm46_vm0 = vcmp.ge.s32.totalorder %v118_v16, 168  ;;  %vm50_vm1 = vcmp.ge.s32.totalorder %v118_v16, 7718  ;;  %vm54_vm2 = vcmp.ge.s32.totalorder %v118_v16, 143613  ;;  %vm58_vm3 = vcmp.ge.s32.totalorder %v118_v16, 1366672 }
  0x1f   :  { %v119_v18 = vsel %vm46_vm0, 1.0, %v152_v17  ;;  %v120_v19 = vsel %vm50_vm1, 1.0, %v152_v17  ;;  %v121_v20 = vsel %vm54_vm2, 1.0, %v152_v17  ;;  %vm62_vm4 = vcmp.ge.s32.totalorder %v118_v16, 6870438 }
  0x20   :  { %v53_v21 = vadd.f32 %v120_v19, %v119_v18  ;;  %v122_v22 = vsel %vm58_vm3, 1.0, %v152_v17  ;;  %v123_v24 = vsel %vm62_vm4, 1.0, %v152_v17 }
  0x22   :  { %v57_v23 = vadd.f32 %v121_v20, %v53_v21 }
  0x24   :  { %v61_v25 = vadd.f32 %v122_v22, %v57_v23 }
  0x26   :  { %v65_v26 = vadd.f32 %v123_v24, %v61_v25 }
  0x28   :  { %v66_v27 = vmul.f32 0.22222222, %v65_v26  ;;  %v69_v28 = vmul.f32 %v65_v26, %v65_v26 }
  0x2a   :  { %v67_v30 = vmul.f32 %v66_v27, %v19_v29  ;;  %v70_v31 = vmul.f32 0.2, %v69_v28 }
  0x2c   :  { %v71_v33 = vsub.f32 %v65_v26, %v70_v31  ;;  %74 = vst [vmem:[%s197_s2] sm:$0xf] %v67_v30  ;;  %s128_s2 = scalar_lea.vmem %s106_s17, 16 }
  0x2d   :  { %p129_p0 = scmp.ne.s32.totalorder %s106_s17, %s128_s2  ;;  %p134_p2 = scmp.lt.s32.totalorder %s132_s19, %s128_s2 }
  0x2e   :  { %v72_v34 = vmul.f32 0.30864197, %v71_v33 }
  0x2f   :  { %p135_p3 = por %p134_p2, %p133_p1 }
  0x30   :  { %v73_v35 = vmul.f32 %v72_v34, %v68_v32 }
  0x31   :  { %p136_p4 = pnand %p135_p3, %p129_p0 }
  0x32   :  { %v77_v36 = vsel %vm76_vm5, %v73_v35, 0.0 }
  0x33   :  { %78 = vadd.xlane.f32.xlu0 %v77_v36 }
  0xc0   :  { %v79_v37 = vpop.xlane.xlu0 %78 }
  0xc1   :  { %v80_v38 = vrot.slane %v79_v37, 4 }
  0xc3   :  { %v81_v39 = vadd.f32 %v80_v38, %v79_v37 }
  0xc5   :  { %v82_v40 = vrot.slane %v81_v39, 2 }
  0xc7   :  { %v83_v41 = vadd.f32 %v82_v40, %v81_v39 }
  0xc9   :  { %v84_v42 = vrot.slane %v83_v41, 1 }
  0xcb   :  { %v85_v43 = vadd.f32 %v84_v42, %v83_v41 }
  0xcd   :  { %124 = vpush %v85_v43 }
  0xfe   :  { %s125_s18 = spop %124 }
  0xff   :  { %v94_v44 = vstv %s125_s18 }
 0x100   :  { %96 = vst.msk [vmem:[#allocation5] sm:$0x1] %vm95_vm6, %v94_v44 }
 0x101   :  { %139 = shalt.err (!%p136_p4)
}
 0x102   :  { %s140_s22 = scalar_lea.hbm %s198_s3, 16 }
 0x103   :  { %p141_p5 = scmp.ne.s32.totalorder %s198_s3, %s140_s22  ;;  %p144_p6 = scmp.lt.u32.totalorder %s140_s22, %s198_s3 }
 0x105   :  { %p146_p7 = pnand %p144_p6, %p141_p5 }
 0x107   :  { %149 = shalt.err (!%p146_p7)
}
 0x108   :  { %108 = dma.vmem_to_hbm [thread:$0]  %s106_s17, 16, %s198_s3, [#allocation6]  }
 0x109   :  { %150 = dma.done.wait [#allocation6], 16  }
 0x10a   :  { %151 = vsyncadd [#allocation6], 4294967280 }
 0x10b   :  { %114 = vsyncpa [#allocation6], 1 }

</bundles_post_ra>
